<compile_context>
chip_gen: v6e
topology: v6e:2x2x1
jax: 0.10.0
libtpu: 0.0.40
codegen_flags: <defaults>
</compile_context>

<pallas_src>
import jax
import jax.numpy as jnp
from jax import lax
from jax.experimental import pallas as pl
from jax.experimental.pallas import tpu as pltpu

VMEM_LIMIT_BYTES = 48 * 1024 * 1024


def mlp_kernel(x_ref, w1_ref, b1_ref, w2_ref, b2_ref, w3_ref, b3_ref, o_ref):
    # fc1 + ReLU: contract the feature axis of both operands:
    # (50, D) . (block_m, D) -> (50, block_m); batch lives on the lane axis.
    h1 = lax.dot_general(
        w1_ref[...], x_ref[...],
        dimension_numbers=(((1,), (1,)), ((), ())),
        preferred_element_type=jnp.float32)
    h1 = jnp.maximum(h1 + b1_ref[...], 0.0)          # (50, 1) bias lane-broadcasts
    # fc2 + ReLU: (20, 50) @ (50, block_m) -> (20, block_m)
    h2 = jnp.dot(w2_ref[...], h1, preferred_element_type=jnp.float32)
    h2 = jnp.maximum(h2 + b2_ref[...], 0.0)
    # fc3: (1, 20) @ (20, block_m) -> (1, block_m)  -- lane-dense output row
    out = jnp.dot(w3_ref[...], h2, preferred_element_type=jnp.float32)
    o_ref[...] = (out + b3_ref[...]).astype(o_ref.dtype)


def _round_up(v, m):
    return ((v + m - 1) // m) * m


def _cdiv(a, b):
    return (a + b - 1) // b


def _choose_block_m(B, D, block_m_max):
    """Batch tile: multiple of 128 (lane-dense stores), VMEM-budgeted, >=2 grid
    steps when possible so v7x's two TensorCores both get work."""
    if B <= 128:
        # Single tile equal to the full array extents -- always a legal block.
        return B

    # f32 bytes held in VMEM per batch column:
    #   2x double-buffered x tile (D) + h1 (50) + h2 (20) + 2x output row (1).
    bytes_per_col = (2 * D + 50 + 20 + 2) * 4
    budget = (VMEM_LIMIT_BYTES * 3) // 4            # headroom for weights/scratch
    bm_budget = max(128, (budget // bytes_per_col) // 128 * 128)

    block_m_max = max(128, (block_m_max // 128) * 128)
    b_aligned = _round_up(B, 128)
    block_m = min(block_m_max, bm_budget, b_aligned)

    # v7x megacore: if the batch spans >=2 lane tiles, guarantee >=2 grid steps.
    if b_aligned >= 256 and _cdiv(B, block_m) < 2:
        block_m = _round_up(_cdiv(b_aligned, 2), 128)
    return block_m


def regression_model_forward(x, params, *, block_m_max=8192):
    """x: (B, input_size) float32. params: PyTorch-layout weights (out, in),
    biases stored as (out, 1). Returns (B, 1) float32."""
    B, D = x.shape
    w1, b1 = params["w1"], params["b1"]
    w2, b2 = params["w2"], params["b2"]
    w3, b3 = params["w3"], params["b3"]

    block_m = _choose_block_m(B, D, block_m_max)
    grid = (_cdiv(B, block_m),)

    in_specs = [
        pl.BlockSpec((block_m, D), lambda i: (i, 0)),   # contiguous HBM slab of x
        pl.BlockSpec(w1.shape, lambda i: (0, 0)),       # resident weights/biases
        pl.BlockSpec(b1.shape, lambda i: (0, 0)),
        pl.BlockSpec(w2.shape, lambda i: (0, 0)),
        pl.BlockSpec(b2.shape, lambda i: (0, 0)),
        pl.BlockSpec(w3.shape, lambda i: (0, 0)),
        pl.BlockSpec(b3.shape, lambda i: (0, 0)),
    ]
    out_spec = pl.BlockSpec((1, block_m), lambda i: (0, i))   # lane-dense row

    out_row = pl.pallas_call(
        mlp_kernel,
        out_shape=jax.ShapeDtypeStruct((1, B), jnp.float32),
        grid=grid,
        in_specs=in_specs,
        out_specs=out_spec,
        compiler_params=pltpu.CompilerParams(
            dimension_semantics=("parallel",),
            vmem_limit_bytes=VMEM_LIMIT_BYTES,
        ),
    )(x, w1, b1, w2, b2, w3, b3)

    return out_row[0, :, None]                              # (B, 1)


def init_params(key, input_size):
    """PyTorch nn.Linear layout: weight (out, in), bias stored as (out, 1)."""
    k1, k2, k3, k4, k5, k6 = jax.random.split(key, 6)

    def uniform_init(k, shape, fan_in):
        bound = 1.0 / float(fan_in) ** 0.5
        return jax.random.uniform(k, shape, jnp.float32, -bound, bound)

    return {
        "w1": uniform_init(k1, (50, input_size), input_size),
        "b1": uniform_init(k2, (50, 1), input_size),
        "w2": uniform_init(k3, (20, 50), 50),
        "b2": uniform_init(k4, (20, 1), 50),
        "w3": uniform_init(k5, (1, 20), 20),
        "b3": uniform_init(k6, (1, 1), 20),
    }


def reference_forward(x, params):
    h1 = jnp.maximum(x @ params["w1"].T + params["b1"].T, 0.0)
    h2 = jnp.maximum(h1 @ params["w2"].T + params["b2"].T, 0.0)
    return h2 @ params["w3"].T + params["b3"].T


if __name__ == "__main__":
    key = jax.random.PRNGKey(0)
    kx, kx2, kp = jax.random.split(key, 3)

    input_size = 32
    params = init_params(kp, input_size)

    # Small primary test (single full-extent tile path).
    batch = 16
    x = jax.random.normal(kx, (batch, input_size), jnp.float32)
    out = jax.block_until_ready(regression_model_forward(x, params))
    ref = reference_forward(x, params)
    assert out.shape == (batch, 1)
    assert jnp.allclose(out, ref, atol=1e-5, rtol=1e-4), "mismatch vs reference (B=16)"

    # Multi-tile test with a ragged final block (exercises masked edge blocks
    # and the >=2-grid-step / lane-dense store path).
    batch2 = 272
    x2 = jax.random.normal(kx2, (batch2, input_size), jnp.float32)
    out2 = jax.block_until_ready(regression_model_forward(x2, params))
    ref2 = reference_forward(x2, params)
    assert out2.shape == (batch2, 1)
    assert jnp.allclose(out2, ref2, atol=1e-5, rtol=1e-4), "mismatch vs reference (B=272)"

    print("KERNEL_OK")
</pallas_src>

<mosaic_0001>
module attributes {stable_mosaic.version = 11 : i64} {
  func.func @mlp_kernel(%arg0: i32, %arg1: memref<16x32xf32, #tpu.memory_space<vmem>>, %arg2: memref<50x32xf32, #tpu.memory_space<vmem>>, %arg3: memref<50x1xf32, #tpu.memory_space<vmem>>, %arg4: memref<20x50xf32, #tpu.memory_space<vmem>>, %arg5: memref<20x1xf32, #tpu.memory_space<vmem>>, %arg6: memref<1x20xf32, #tpu.memory_space<vmem>>, %arg7: memref<1x1xf32, #tpu.memory_space<vmem>>, %arg8: memref<1x16xf32, #tpu.memory_space<vmem>>) attributes {dimension_semantics = [#tpu.dimension_semantics<parallel>], iteration_bounds = array<i64: 1>, scalar_prefetch = 0 : i64, scratch_operands = 0 : i64, tpu.core_type = #tpu.core_type<tc>, window_params = [{transform_indices = @transform_0, window_bounds = array<i64: 16, 32>}, {pipeline_mode = #tpu.pipeline_mode<synchronous>, transform_indices = @transform_1, window_bounds = array<i64: 50, 32>}, {pipeline_mode = #tpu.pipeline_mode<synchronous>, transform_indices = @transform_2, window_bounds = array<i64: 50, 1>}, {pipeline_mode = #tpu.pipeline_mode<synchronous>, transform_indices = @transform_3, window_bounds = array<i64: 20, 50>}, {pipeline_mode = #tpu.pipeline_mode<synchronous>, transform_indices = @transform_4, window_bounds = array<i64: 20, 1>}, {pipeline_mode = #tpu.pipeline_mode<synchronous>, transform_indices = @transform_5, window_bounds = array<i64: 1, 20>}, {pipeline_mode = #tpu.pipeline_mode<synchronous>, transform_indices = @transform_6, window_bounds = array<i64: 1, 1>}, {transform_indices = @transform_7, window_bounds = array<i64: 1, 16>}]} {
    %c0 = arith.constant 0 : index
    %c0_0 = arith.constant 0 : index
    %0 = vector.load %arg2[%c0, %c0_0] : memref<50x32xf32, #tpu.memory_space<vmem>>, vector<50x32xf32>
    %c0_1 = arith.constant 0 : index
    %c0_2 = arith.constant 0 : index
    %1 = vector.load %arg1[%c0_1, %c0_2] : memref<16x32xf32, #tpu.memory_space<vmem>>, vector<16x32xf32>
    %cst = arith.constant dense<0.000000e+00> : vector<50x16xf32>
    %2 = tpu.matmul %0, %1, %cst {dimension_numbers = #tpu.dot_dimension_numbers<[1], [1], [0], [0], [0, 0, 1, 0], [], []>} : vector<50x32xf32>, vector<16x32xf32>, vector<50x16xf32> -> vector<50x16xf32>
    %c0_3 = arith.constant 0 : index
    %c0_4 = arith.constant 0 : index
    %3 = vector.load %arg3[%c0_3, %c0_4] : memref<50x1xf32, #tpu.memory_space<vmem>>, vector<50x1xf32>
    %4 = vector.broadcast %3 : vector<50x1xf32> to vector<50x16xf32>
    %5 = arith.addf %2, %4 : vector<50x16xf32>
    %cst_5 = arith.constant 0.000000e+00 : f32
    %6 = vector.broadcast %cst_5 : f32 to vector<50x16xf32>
    %7 = arith.maximumf %5, %6 : vector<50x16xf32>
    %c0_6 = arith.constant 0 : index
    %c0_7 = arith.constant 0 : index
    %8 = vector.load %arg4[%c0_6, %c0_7] : memref<20x50xf32, #tpu.memory_space<vmem>>, vector<20x50xf32>
    %cst_8 = arith.constant dense<0.000000e+00> : vector<20x16xf32>
    %9 = tpu.matmul %8, %7, %cst_8 {dimension_numbers = #tpu.dot_dimension_numbers<[1], [0], [0], [1], [0, 0, 1, 1], [], []>} : vector<20x50xf32>, vector<50x16xf32>, vector<20x16xf32> -> vector<20x16xf32>
    %c0_9 = arith.constant 0 : index
    %c0_10 = arith.constant 0 : index
    %10 = vector.load %arg5[%c0_9, %c0_10] : memref<20x1xf32, #tpu.memory_space<vmem>>, vector<20x1xf32>
    %11 = vector.broadcast %10 : vector<20x1xf32> to vector<20x16xf32>
    %12 = arith.addf %9, %11 : vector<20x16xf32>
    %cst_11 = arith.constant 0.000000e+00 : f32
    %13 = vector.broadcast %cst_11 : f32 to vector<20x16xf32>
    %14 = arith.maximumf %12, %13 : vector<20x16xf32>
    %c0_12 = arith.constant 0 : index
    %c0_13 = arith.constant 0 : index
    %15 = vector.load %arg6[%c0_12, %c0_13] : memref<1x20xf32, #tpu.memory_space<vmem>>, vector<1x20xf32>
    %cst_14 = arith.constant dense<0.000000e+00> : vector<1x16xf32>
    %16 = tpu.matmul %15, %14, %cst_14 {dimension_numbers = #tpu.dot_dimension_numbers<[1], [0], [0], [1], [0, 0, 1, 1], [], []>} : vector<1x20xf32>, vector<20x16xf32>, vector<1x16xf32> -> vector<1x16xf32>
    %c0_15 = arith.constant 0 : index
    %c0_16 = arith.constant 0 : index
    %17 = vector.load %arg7[%c0_15, %c0_16] : memref<1x1xf32, #tpu.memory_space<vmem>>, vector<1x1xf32>
    %18 = vector.broadcast %17 : vector<1x1xf32> to vector<1x16xf32>
    %19 = arith.addf %16, %18 : vector<1x16xf32>
    %c0_17 = arith.constant 0 : index
    %c0_18 = arith.constant 0 : index
    %20 = vector.load %arg8[%c0_17, %c0_18] : memref<1x16xf32, #tpu.memory_space<vmem>>, vector<1x16xf32>
    tpu.vector_store %arg8[%c0_17, %c0_18], %19 {strides = array<i32>} : memref<1x16xf32, #tpu.memory_space<vmem>>, vector<1x16xf32>,
    return
  }
  func.func @transform_0(%arg0: i32) -> (i32, i32) {
    %c0_i32 = arith.constant 0 : i32
    %c0_i32_0 = arith.constant 0 : i32
    return %arg0, %c0_i32 : i32, i32
  }
  func.func @transform_1(%arg0: i32) -> (i32, i32) {
    %c0_i32 = arith.constant 0 : i32
    %c0_i32_0 = arith.constant 0 : i32
    %c0_i32_1 = arith.constant 0 : i32
    return %c0_i32, %c0_i32_0 : i32, i32
  }
  func.func @transform_2(%arg0: i32) -> (i32, i32) {
    %c0_i32 = arith.constant 0 : i32
    %c0_i32_0 = arith.constant 0 : i32
    %c0_i32_1 = arith.constant 0 : i32
    return %c0_i32, %c0_i32_0 : i32, i32
  }
  func.func @transform_3(%arg0: i32) -> (i32, i32) {
    %c0_i32 = arith.constant 0 : i32
    %c0_i32_0 = arith.constant 0 : i32
    %c0_i32_1 = arith.constant 0 : i32
    return %c0_i32, %c0_i32_0 : i32, i32
  }
  func.func @transform_4(%arg0: i32) -> (i32, i32) {
    %c0_i32 = arith.constant 0 : i32
    %c0_i32_0 = arith.constant 0 : i32
    %c0_i32_1 = arith.constant 0 : i32
    return %c0_i32, %c0_i32_0 : i32, i32
  }
  func.func @transform_5(%arg0: i32) -> (i32, i32) {
    %c0_i32 = arith.constant 0 : i32
    %c0_i32_0 = arith.constant 0 : i32
    %c0_i32_1 = arith.constant 0 : i32
    return %c0_i32, %c0_i32_0 : i32, i32
  }
  func.func @transform_6(%arg0: i32) -> (i32, i32) {
    %c0_i32 = arith.constant 0 : i32
    %c0_i32_0 = arith.constant 0 : i32
    %c0_i32_1 = arith.constant 0 : i32
    return %c0_i32, %c0_i32_0 : i32, i32
  }
  func.func @transform_7(%arg0: i32) -> (i32, i32) {
    %c0_i32 = arith.constant 0 : i32
    %c0_i32_0 = arith.constant 0 : i32
    return %c0_i32, %arg0 : i32, i32
  }
}

</mosaic_0001>

<bundles_post_ra>
// kernel: tpu_custom_call.1
= control target key start
LH: loop header
LB: loop body
LE: loop exit
PB: predicated region body
PF: predicated region fallthrough
CT: control target
= control target key end

     0   :  { %s723_s0 = inlined_call_operand.vmem [shape: f32[16,32], index: 0, kind: input, shape index: {}]   ;;  %s724_s1 = inlined_call_operand.vmem [shape: f32[50,32], index: 1, kind: input, shape index: {}]   ;;  %s725_s2 = inlined_call_operand.vmem [shape: f32[50,1], index: 2, kind: input, shape index: {}]   ;;  %s726_s3 = inlined_call_operand.vmem [shape: f32[20,50], index: 3, kind: input, shape index: {}]   ;;  %s727_s4 = inlined_call_operand.vmem [shape: f32[20,1], index: 4, kind: input, shape index: {}]   ;;  %s728_s5 = inlined_call_operand.vmem [shape: f32[1,20], index: 5, kind: input, shape index: {}]   ;;  %s729_s6 = inlined_call_operand.<no memory space> [shape: f32[1,1], index: 6, kind: input, shape index: {}]   ;;  %s730_s7 = inlined_call_operand.hbm [shape: f32[1,16], index: 7, kind: output, shape index: {}]  }
   0x1   :  { %v12_v0 = vstv %s729_s6 }
   0x2   :  { %13 = vst [vmem:[#allocation2] sm:$0x1] %v12_v0 }
   0x3   :  { %v37_v1 = vld [vmem:[%s723_s0 + $0x8] sm:$0xff]  ;;  %vm80_vm0 = vcmask 261120   ;;  %v561_v2 = vmov 0.0   ;;  %vm562_vm1 = vmmov 0   ;;  %v563_v3 = vmov 0   ;;  %v36_v4 = vld [vmem:[%s723_s0] sm:$0xff] }
   0x4   :  { %476 = vmatprep.subr.mxu0 %v561_v2  ;;  %480 = vmatprep.mubr.msk.f32.mxu0 %vm562_vm1, %v561_v2  ;;  %v44_v5 = vld [vmem:[%s725_s2 + $0x30] sm:$0x3]  ;;  %v42_v6 = vld [vmem:[%s725_s2 + $0x20] sm:$0xff]  ;;  %v43_v7 = vld [vmem:[%s725_s2 + $0x28] sm:$0xff] }
   0x5   :  { %477 = vmatpush3.xpose.msk.msra.mxu0 %vm80_vm0, %v37_v1  ;;  %537 = vset.pattern.permute.xlu0 %v563_v3  ;;  %v41_v8 = vld [vmem:[%s725_s2 + $0x18] sm:$0xff]  ;;  %v29_v9 = vld [vmem:[%s724_s1] sm:$0xff] }
   0x6   :  { %478 = vmatprep.subr.mxu0 %v561_v2  ;;  %538 = vset.pattern.permute.xlu1 %v563_v3 }
   0x7   :  { %77 = vperm.xlu0 %537, %v44_v5   ;;  %67 = vperm.xlu1 %538, %v42_v6  }
   0x8   :  { %501 = vmatprep.subr.mxu1 %v561_v2  ;;  %515 = vmatprep.mubr.msk.f32.mxu1 %vm562_vm1, %v561_v2 }
   0x9   :  { %479 = vmatpush3.xpose.msk.msra.mxu0 %vm80_vm0, %v36_v4 }
   0xa   :  { %14 = vsyncpa [#allocation4], 0  ;;  %v40_v10 = vld [vmem:[%s725_s2 + $0x10] sm:$0xff]  ;;  %v39_v11 = vld [vmem:[%s725_s2 + $0x8] sm:$0xff]  ;;  %vm246_vm2 = vcmask 1041408   ;;  %vm236_vm3 = vcmask 408576  }
   0xb   :  { %72 = vperm.xlu0 %537, %v43_v7   ;;  %62 = vperm.xlu1 %538, %v41_v8   ;;  %v30_v12 = vld [vmem:[%s724_s1 + $0x8] sm:$0xff]  ;;  %v38_v13 = vld [vmem:[%s725_s2] sm:$0xff]  ;;  %v220_v14 = vld [vmem:[%s727_s4 + $0x10] sm:$0xf]  ;;  %vm348_vm4 = vcmask 1043456   ;;  %vm344_vm5 = vcmask 162816  }
   0xc   :  { %481 = vmatmul.mubr.msk.f32.vlgmr.msra.gmra.mxu0 %vm80_vm0, %v29_v9  ;;  %v31_v15 = vld [vmem:[%s724_s1 + $0x10] sm:$0xff]  ;;  %v219_v16 = vld [vmem:[%s727_s4 + $0x8] sm:$0xff]  ;;  %v218_v17 = vld [vmem:[%s727_s4] sm:$0xff]  ;;  %s564_s18 = smov [#allocation3]   ;;  %vm422_vm6 = vcmask 122880  }
   0xd   :  { %483 = vmatprep.mubr.msk.f32.mxu0 %vm562_vm1, %v561_v2  ;;  %v32_v18 = vld [vmem:[%s724_s1 + $0x18] sm:$0xff]  ;;  %v334_v19 = vld [vmem:[#allocation2] sm:$0x1]  ;;  %v34_v21 = vld [vmem:[%s724_s1 + $0x28] sm:$0xff]  ;;  %s430_s19 = sshll.u32 %s564_s18, 4  ;;  %s431_s19 = int_to_ptr.vmem [resolvable:$true] %s430_s19 }
   0xe   :  { %v33_v20 = vld [vmem:[%s724_s1 + $0x20] sm:$0xff]  ;;  %v35_v22 = vld [vmem:[%s724_s1 + $0x30] sm:$0x3]  ;;  %v216_v59 = vld [vmem:[%s726_s3 + $0x8] sm:$0xff]  ;;  %s539_s20 = scalar_lea.vmem %s431_s19, 16  ;;  %p544_p1 = scmp.lt.s32.totalorder %s431_s19, %s431_s19 }
   0xf   :  { %57 = vperm.xlu0 %537, %v40_v10   ;;  %52 = vperm.xlu1 %538, %v39_v11   ;;  %v215_v58 = vld [vmem:[%s726_s3] sm:$0xff]  ;;  %v217_v60 = vld [vmem:[%s726_s3 + $0x10] sm:$0xf]  ;;  %p540_p0 = scmp.ne.s32.totalorder %s431_s19, %s539_s20 }
  0x10   :  { %484 = vmatmul.mubr.msk.f32.gmra.mxu0 %vm80_vm0, %v30_v12 }
  0x11   :  { %486 = vmatprep.mubr.msk.f32.mxu0 %vm562_vm1, %v561_v2 }
  0x13   :  { %47 = vperm.xlu0 %537, %v38_v13   ;;  %233 = vperm.xlu1 %538, %v220_v14   ;;  %v333_v13 = vld [vmem:[%s728_s5] sm:$0x1]  ;;  %v340_v14 = vlaneseq  ;;  %s543_s5 = scalar_lea.vmem %s431_s19, 32 }
  0x14   :  { %487 = vmatmul.mubr.msk.f32.gmra.mxu0 %vm80_vm0, %v31_v15  ;;  %p545_p2 = scmp.lt.s32.totalorder %s543_s5, %s539_s20 }
  0x15   :  { %489 = vmatprep.mubr.msk.f32.mxu0 %vm562_vm1, %v561_v2  ;;  %v341_v15 = vshrl.u32 %v340_v14, 7 }
  0x16   :  { %p546_p3 = por %p545_p2, %p544_p1 }
  0x17   :  { %228 = vperm.xlu0 %537, %v219_v16   ;;  %223 = vperm.xlu1 %538, %v218_v17   ;;  %v342_v16 = vsub.s32 0, %v341_v15 }
  0x18   :  { %490 = vmatmul.mubr.msk.f32.gmra.mxu0 %vm80_vm0, %v32_v18  ;;  %p547_p4 = pnand %p546_p3, %p540_p0 }
  0x19   :  { %492 = vmatprep.mubr.msk.f32.mxu0 %vm562_vm1, %v561_v2 }
  0x1b   :  { %337 = vperm.xlu0 %537, %v334_v19  }
  0x1c   :  { %493 = vmatmul.mubr.msk.f32.gmra.mxu0 %vm80_vm0, %v33_v20 }
  0x1d   :  { %495 = vmatprep.mubr.msk.f32.mxu0 %vm562_vm1, %v561_v2 }
  0x20   :  { %496 = vmatmul.mubr.msk.f32.gmra.mxu0 %vm80_vm0, %v34_v21 }
  0x21   :  { %498 = vmatprep.mubr.msk.f32.mxu0 %vm562_vm1, %v561_v2 }
  0x24   :  { %499 = vmatmul.mubr.msk.f32.gmra.mxu0 %vm80_vm0, %v35_v22 }
  0x82   :  { %v78_v30 = vpop.permute.xlu0 %77  ;;  %v68_v33 = vpop.permute.xlu1 %67 }
  0x86   :  { %v73_v35 = vpop.permute.xlu0 %72  ;;  %v63_v38 = vpop.permute.xlu1 %62 }
  0x8a   :  { %v58_v42 = vpop.permute.xlu0 %57  ;;  %v53_v48 = vpop.permute.xlu1 %52 }
  0x8e   :  { %v48_v51 = vpop.permute.xlu0 %47  ;;  %v234_v63 = vpop.permute.xlu1 %233 }
  0x92   :  { %v229_v3 = vpop.permute.xlu0 %228  ;;  %v224_v7 = vpop.permute.xlu1 %223 }
  0x96   :  { %v338_v17 = vpop.permute.xlu0 %337 }
  0x97   :  { %v343_v18 = vrot.slane %v338_v17, %v342_v16 }
  0xcc   :  { %v174_v23 = vpop.f32.mrf.mxu0 }
  0xcd   :  { %v175_v54 = vadd.f32 %v174_v23, %v48_v51 }
  0xce   :  { %v482_v24 = vpop.f32.mrf.mxu0 }
  0xcf   :  { %v208_v57 = vmax.f32 %v175_v54, 0.0 }
  0xd0   :  { %v179_v25 = vpop.f32.mrf.mxu0 }
  0xd1   :  { %v180_v52 = vadd.f32 %v179_v25, %v53_v48 }
  0xd2   :  { %v485_v26 = vpop.f32.mrf.mxu0 }
  0xd3   :  { %v209_v56 = vmax.f32 %v180_v52, 0.0 }
  0xd4   :  { %v184_v27 = vpop.f32.mrf.mxu0 }
  0xd5   :  { %v185_v49 = vadd.f32 %v184_v27, %v58_v42 }
  0xd6   :  { %v488_v28 = vpop.f32.mrf.mxu0 }
  0xd7   :  { %v210_v55 = vmax.f32 %v185_v49, 0.0 }
  0xd8   :  { %v189_v29 = vpop.f32.mrf.mxu0 }
  0xd9   :  { %v190_v46 = vadd.f32 %v189_v29, %v63_v38 }
  0xda   :  { %v491_v31 = vpop.f32.mrf.mxu0 }
  0xdb   :  { %v211_v53 = vmax.f32 %v190_v46, 0.0 }
  0xdc   :  { %v194_v32 = vpop.f32.mrf.mxu0 }
  0xdd   :  { %v195_v44 = vadd.f32 %v194_v32, %v68_v33 }
  0xde   :  { %v494_v34 = vpop.f32.mrf.mxu0 }
  0xdf   :  { %v212_v50 = vmax.f32 %v195_v44, 0.0 }
  0xe0   :  { %v199_v36 = vpop.f32.mrf.mxu0 }
  0xe1   :  { %v200_v40 = vadd.f32 %v199_v36, %v73_v35 }
  0xe2   :  { %v497_v37 = vpop.f32.mrf.mxu0 }
  0xe3   :  { %v213_v47 = vmax.f32 %v200_v40, 0.0 }
  0xe4   :  { %v204_v39 = vpop.f32.mrf.mxu0 }
  0xe5   :  { %v205_v41 = vadd.f32 %v204_v39, %v78_v30 }
  0xe6   :  { %v500_v43 = vpop.f32.mrf.mxu0 }
  0xe7   :  { %v214_v45 = vmax.f32 %v205_v41, 0.0 }
  0xe9   :  { %502 = vmatpush3.msk.msra.mxu1 %vm246_vm2, %v214_v45 }
  0xea   :  { %503 = vmatprep.subr.mxu1 %v561_v2 }
  0xeb   :  { %504 = vmatpush3.msra.mxu1 %v213_v47 }
  0xec   :  { %505 = vmatprep.subr.mxu1 %v561_v2 }
  0xed   :  { %506 = vmatpush3.msra.mxu1 %v212_v50 }
  0xee   :  { %507 = vmatprep.subr.mxu1 %v561_v2 }
  0xef   :  { %508 = vmatpush3.msra.mxu1 %v211_v53 }
  0xf0   :  { %509 = vmatprep.subr.mxu1 %v561_v2 }
  0xf1   :  { %510 = vmatpush3.msra.mxu1 %v210_v55 }
  0xf2   :  { %511 = vmatprep.subr.mxu1 %v561_v2 }
  0xf3   :  { %512 = vmatpush3.msra.mxu1 %v209_v56 }
  0xf4   :  { %513 = vmatprep.subr.mxu1 %v561_v2 }
  0xf5   :  { %514 = vmatpush3.msra.mxu1 %v208_v57 }
  0xf6   :  { %516 = vmatmul.mubr.msk.f32.vlgmr.msra.gmra.mxu1 %vm236_vm3, %v215_v58  ;;  %524 = vmatprep.subr.mxu1 %v561_v2 }
  0xf7   :  { %518 = vmatprep.mubr.msk.f32.mxu1 %vm562_vm1, %v561_v2 }
  0xfa   :  { %519 = vmatmul.mubr.msk.f32.gmra.mxu1 %vm236_vm3, %v216_v59 }
  0xfb   :  { %521 = vmatprep.mubr.msk.f32.mxu1 %vm562_vm1, %v561_v2 }
  0xfe   :  { %522 = vmatmul.mubr.msk.f32.gmra.mxu1 %vm236_vm3, %v217_v60 }
  0xff   :  { %530 = vmatprep.mubr.msk.f32.mxu1 %vm562_vm1, %v561_v2 }
 0x1b6   :  { %v316_v61 = vpop.f32.mrf.mxu1 }
 0x1b7   :  { %v317_v9 = vadd.f32 %v316_v61, %v224_v7 }
 0x1b8   :  { %v517_v62 = vpop.f32.mrf.mxu1 }
 0x1b9   :  { %v330_v12 = vmax.f32 %v317_v9, 0.0 }
 0x1ba   :  { %v321_v0 = vpop.f32.mrf.mxu1 }
 0x1bb   :  { %v322_v5 = vadd.f32 %v321_v0, %v229_v3 }
 0x1bc   :  { %v520_v1 = vpop.f32.mrf.mxu1 }
 0x1bd   :  { %v331_v11 = vmax.f32 %v322_v5, 0.0 }
 0x1be   :  { %v326_v4 = vpop.f32.mrf.mxu1 }
 0x1bf   :  { %v327_v6 = vadd.f32 %v326_v4, %v234_v63 }
 0x1c0   :  { %v523_v8 = vpop.f32.mrf.mxu1 }
 0x1c1   :  { %v332_v10 = vmax.f32 %v327_v6, 0.0 }
 0x1c3   :  { %525 = vmatpush3.msk.msra.mxu1 %vm348_vm4, %v332_v10 }
 0x1c4   :  { %526 = vmatprep.subr.mxu1 %v561_v2 }
 0x1c5   :  { %527 = vmatpush3.msra.mxu1 %v331_v11 }
 0x1c6   :  { %528 = vmatprep.subr.mxu1 %v561_v2 }
 0x1c7   :  { %529 = vmatpush3.msra.mxu1 %v330_v12 }
 0x1c8   :  { %531 = vmatmul.mubr.msk.f32.vlgmr.msra.gmra.mxu1 %vm344_vm5, %v333_v13 }
 0x288   :  { %v418_v19 = vpop.f32.mrf.mxu1 }
 0x289   :  { %v419_v20 = vadd.f32 %v418_v19, %v343_v18 }
 0x28a   :  { %v532_v21 = vpop.f32.mrf.mxu1 }
 0x28b   :  { %423 = vst.msk [vmem:[#allocation3] sm:$0x1] %vm422_vm6, %v419_v20 }
 0x28c   :  { %550 = shalt.err (!%p547_p4)
}
 0x28d   :  { %433 = dma.vmem_to_hbm [thread:$0]  %s431_s19, 16, %s730_s7, [#allocation4]  }
 0x28e   :  { %559 = dma.done.wait [#allocation4], 16  }
 0x28f   :  { %560 = vsyncadd [#allocation4], 4294967280 }
 0x290   :  { %437 = vsyncpa [#allocation4], 1 }

</bundles_post_ra>
